<compile_context>
chip_gen: v7x
topology: tpu7x:2x2x1
jax: 0.10.0
libtpu: 0.0.40
codegen_flags: <defaults>
</compile_context>

<pallas_src>
import functools
from typing import NamedTuple

import jax
import jax.numpy as jnp
import numpy as np
from jax.experimental import pallas as pl
from jax.experimental.pallas import tpu as pltpu


def _round_up(x, m):
    return ((x + m - 1) // m) * m


@functools.lru_cache(maxsize=1)
def _default_vmem_limit_bytes():
    """Generation-aware scoped-VMEM limit (~75% of per-core physical VMEM)."""
    try:
        cap = int(pltpu.get_tpu_info().vmem_capacity_bytes)
        return max(32 * 1024 * 1024, (cap * 3) // 4)
    except Exception:
        return 48 * 1024 * 1024  # safe cap on every generation


def _mish(v, approx_recip):
    # mish(x) = x * tanh(softplus(x)) = x * u/(u+2),  u = t*(t+2), t = exp(x)
    # Single transcendental (exp); clamp + where guard the large-x identity
    # regime.  NOTE: intentional numerics divergence from canonical
    # tanh(softplus) on the approx path (EUP vrcp, ~1e-3 rel); v = -inf gives
    # NaN just like the canonical form.
    t = jnp.exp(jnp.minimum(v, 20.0))
    u = t * (t + 2.0)
    d = u + 2.0
    if approx_recip:
        # EUP reciprocal on a separate bundle slot; f32 operand keeps the
        # lowering portable across generations.
        y = (v * u) * pl.reciprocal(d.astype(jnp.float32), approx=True).astype(v.dtype)
    else:
        y = v * (u / d)
    return jnp.where(v > 20.0, v, y)


def _mlp_kernel(x_ref, w_in_ref, b_in_ref,
                w1_ref, b1_ref, w2_ref, b2_ref,
                wh_ref, bh_ref,
                out_ref, *, approx_recip, mish_dtype):
    cdt = w_in_ref.dtype  # MXU operand dtype (bf16 or f32)

    # Input projection (f32 accumulate, f32 bias).
    h = jnp.dot(x_ref[...], w_in_ref[...],
                preferred_element_type=jnp.float32) + b_in_ref[...]

    n_blocks = w1_ref.shape[0]

    def block(blk, h):
        a = _mish(h.astype(mish_dtype), approx_recip).astype(cdt)
        t = jnp.dot(a, w1_ref[blk],
                    preferred_element_type=jnp.float32) + b1_ref[blk]
        a = _mish(t.astype(mish_dtype), approx_recip).astype(cdt)
        t = jnp.dot(a, w2_ref[blk],
                    preferred_element_type=jnp.float32) + b2_ref[blk]
        return h + t  # residual stream stays f32

    if n_blocks <= 4:
        # Short trip count: fully unroll at trace time.
        for blk in range(n_blocks):
            h = block(blk, h)
    else:
        # Partial unroll (2): gives the LLO scheduler visibility across block
        # boundaries while bounding code size / vreg live ranges.
        h = jax.lax.fori_loop(0, n_blocks, block, h, unroll=2)

    # Fused distribution heads: one lane-dense matmul + one unmasked store.
    out_ref[...] = (jnp.dot(h.astype(cdt), wh_ref[...],
                            preferred_element_type=jnp.float32)
                    + bh_ref[...]).astype(out_ref.dtype)


class PreparedParams(NamedTuple):
    """Padded / pre-cast weights.  Build ONCE with prepare_params(), reuse."""
    w_in: jax.Array   # [Dp_in, Hp]        compute dtype
    b_in: jax.Array   # [1, Hp]            f32
    w1: jax.Array     # [n_blocks, Hp, Hp] compute dtype
    b1: jax.Array     # [n_blocks, 1, Hp]  f32
    w2: jax.Array     # [n_blocks, Hp, Hp] compute dtype
    b2: jax.Array     # [n_blocks, 1, Hp]  f32
    wh: jax.Array     # [Hp, Dp_out]       fused mean||std head, compute dtype
    bh: jax.Array     # [1, Dp_out]        f32
    d_in: int         # static metadata (never enters a jit trace)
    d_out: int
    mish_in_compute_dtype: bool


def prepare_params(params, compute_dtype=jnp.bfloat16,
                   mish_in_compute_dtype=False):
    """One-time lane-dense / MXU-aligned padding + dtype cast of the weights.

    Hoisted out of the per-call forward: the pad/concat/cast copies every
    weight in HBM, which for small/medium batches can cost more than the
    kernel itself if done per call.  Padding is exact (zero lanes stay zero
    through mish and the residual blocks).

    mish_in_compute_dtype=True evaluates mish in bf16 on the bf16 path
    (recommended on v6e/v7x whose VPU/EUP are bf16-capable; keep False on v5e).
    """
    (w_in, b_in, w1, b1, w2, b2, wm, bm, ws, bs) = params
    D_in, H = w_in.shape
    D_out = wm.shape[1]
    cdt = jnp.dtype(compute_dtype)
    f32 = jnp.float32

    Dp_in = _round_up(D_in, 128)
    Hp = _round_up(H, 128)
    Dp_out = _round_up(2 * D_out, 128)

    w_in_p = jnp.pad(w_in.astype(f32), ((0, Dp_in - D_in), (0, Hp - H))).astype(cdt)
    b_in_p = jnp.pad(b_in.astype(f32), ((0, 0), (0, Hp - H)))
    w1_p = jnp.pad(w1.astype(f32), ((0, 0), (0, Hp - H), (0, Hp - H))).astype(cdt)
    b1_p = jnp.pad(b1.astype(f32), ((0, 0), (0, 0), (0, Hp - H)))
    w2_p = jnp.pad(w2.astype(f32), ((0, 0), (0, Hp - H), (0, Hp - H))).astype(cdt)
    b2_p = jnp.pad(b2.astype(f32), ((0, 0), (0, 0), (0, Hp - H)))

    # Fused heads: [H, 2*D_out] -> padded to 128 lanes for unmasked stores.
    w_heads = jnp.concatenate([wm, ws], axis=1).astype(f32)
    b_heads = jnp.concatenate([bm, bs], axis=1).astype(f32)
    wh_p = jnp.pad(w_heads, ((0, Hp - H), (0, Dp_out - 2 * D_out))).astype(cdt)
    bh_p = jnp.pad(b_heads, ((0, 0), (0, Dp_out - 2 * D_out)))

    return PreparedParams(w_in_p, b_in_p, w1_p, b1_p, w2_p, b2_p, wh_p, bh_p,
                          int(D_in), int(D_out), bool(mish_in_compute_dtype))


def _choose_batch_tile(batch, batch_tile):
    b8 = _round_up(batch, 8)
    bt = max(8, min(_round_up(batch_tile, 8), b8))
    # v7x megacore: prefer >= 2 grid steps so dimension_semantics=("parallel",)
    # can shard the batch axis across both TensorCores (no cost on 1-TC chips).
    if b8 >= 16:
        bt = min(bt, _round_up((b8 + 1) // 2, 8))
    return bt


@functools.partial(jax.jit,
                   static_argnames=("d_out", "bt", "vmem_limit", "mish_in_cdt"))
def _forward(x, w_in, b_in, w1, b1, w2, b2, wh, bh, *,
             d_out, bt, vmem_limit, mish_in_cdt):
    B, d_in = x.shape
    Dp_in, _Hp = w_in.shape
    Dp_out = wh.shape[1]
    cdt = w_in.dtype
    approx_recip = jnp.dtype(cdt).itemsize < 4   # approx EUP recip on bf16 path
    mish_dtype = cdt if (mish_in_cdt and approx_recip) else jnp.float32

    # Per-call input padding only (weights were prepared once, offline).
    Bp = _round_up(B, bt)
    xp = jnp.pad(x.astype(jnp.float32),
                 ((0, Bp - B), (0, Dp_in - d_in))).astype(cdt)

    # Whole-array VMEM residents: single-buffered, copied in once for the
    # whole grid (vs. double-buffered constant-index_map blocks).
    resident = pl.BlockSpec(memory_space=pltpu.MemorySpace.VMEM)

    out = pl.pallas_call(
        functools.partial(_mlp_kernel, approx_recip=approx_recip,
                          mish_dtype=mish_dtype),
        out_shape=jax.ShapeDtypeStruct((Bp, Dp_out), jnp.float32),
        grid_spec=pltpu.PrefetchScalarGridSpec(
            num_scalar_prefetch=0,
            grid=(Bp // bt,),
            in_specs=[
                pl.BlockSpec((bt, Dp_in), lambda i: (i, 0)),  # x: pipelined
                resident, resident,                           # w_in, b_in
                resident, resident,                           # w1, b1
                resident, resident,                           # w2, b2
                resident, resident,                           # fused head W, b
            ],
            out_specs=pl.BlockSpec((bt, Dp_out), lambda i: (i, 0)),
        ),
        compiler_params=pltpu.CompilerParams(
            dimension_semantics=("parallel",),
            vmem_limit_bytes=vmem_limit,
        ),
    )(xp, w_in, b_in, w1, b1, w2, b2, wh, bh)

    mean = out[:B, :d_out]
    std = out[:B, d_out:2 * d_out]
    return mean, std


def distribution_residual_mlp(x, prepared: PreparedParams, *, batch_tile=256):
    """x: [B, input_dim] -> (mean, std), each [B, output_dim] float32.

    `prepared` must come from prepare_params() (one-time weight padding/cast).
    batch_tile is sweepable (e.g. 256/512/1024 for large B); it is rounded to
    a multiple of 8 and capped so the grid has >= 2 steps when B permits.
    """
    if x.shape[1] != prepared.d_in:
        raise ValueError(f"expected input_dim={prepared.d_in}, got {x.shape[1]}")
    bt = _choose_batch_tile(x.shape[0], batch_tile)
    return _forward(x, prepared.w_in, prepared.b_in,
                    prepared.w1, prepared.b1, prepared.w2, prepared.b2,
                    prepared.wh, prepared.bh,
                    d_out=prepared.d_out, bt=bt,
                    vmem_limit=_default_vmem_limit_bytes(),
                    mish_in_cdt=prepared.mish_in_compute_dtype)


# ---------------------------------------------------------------------------
# Synthetic parameter init + pure-JAX reference (canonical mish) for testing.
# ---------------------------------------------------------------------------
def init_params(key, input_dim, hidden_dim, num_hidden_layers, output_dim):
    assert num_hidden_layers % 2 == 0
    n_blocks = num_hidden_layers // 2
    ks = jax.random.split(key, 10)

    def lin(k, fan_in, fan_out):
        bound = 1.0 / np.sqrt(fan_in)
        kw, kb = jax.random.split(k)
        w = jax.random.uniform(kw, (fan_in, fan_out), jnp.float32, -bound, bound)
        b = jax.random.uniform(kb, (1, fan_out), jnp.float32, -bound, bound)
        return w, b

    w_in, b_in = lin(ks[0], input_dim, hidden_dim)

    w1s, b1s, w2s, b2s = [], [], [], []
    for i in range(n_blocks):
        k1 = jax.random.fold_in(ks[1], i)
        k2 = jax.random.fold_in(ks[2], i)
        w1, b1 = lin(k1, hidden_dim, hidden_dim)
        w2, b2 = lin(k2, hidden_dim, hidden_dim)
        w1s.append(w1); b1s.append(b1); w2s.append(w2); b2s.append(b2)
    w1 = jnp.stack(w1s); b1 = jnp.stack(b1s)
    w2 = jnp.stack(w2s); b2 = jnp.stack(b2s)

    wm, bm = lin(ks[8], hidden_dim, output_dim)
    ws, bs = lin(ks[9], hidden_dim, output_dim)
    return (w_in, b_in, w1, b1, w2, b2, wm, bm, ws, bs)


def reference_forward(x, params):
    (w_in, b_in, w1, b1, w2, b2, wm, bm, ws, bs) = params
    mish = lambda v: v * jnp.tanh(jax.nn.softplus(v))   # canonical form
    h = x.astype(jnp.float32) @ w_in + b_in
    for blk in range(w1.shape[0]):
        t = mish(h) @ w1[blk] + b1[blk]
        t = mish(t) @ w2[blk] + b2[blk]
        h = h + t
    return h @ wm + bm, h @ ws + bs


if __name__ == "__main__":
    key = jax.random.PRNGKey(0)

    # --- Config 1: module defaults (input_dim=16, hidden=128, 2 hidden layers
    #     -> 1 residual block, output_dim=1), small batch. ---
    B, D_in, H, NHL, D_out = 8, 16, 128, 2, 1
    kx, kp, kx2, kp2 = jax.random.split(key, 4)
    x = jax.random.normal(kx, (B, D_in), jnp.float32)
    params = init_params(kp, D_in, H, NHL, D_out)
    ref_mean, ref_std = reference_forward(x, params)

    # f32 compute path: tight tolerance (proves the single-exp mish rewrite,
    # head fusion and padding are exact).  Weights prepared ONCE.
    prep_f32 = prepare_params(params, compute_dtype=jnp.float32)
    mean, std = distribution_residual_mlp(x, prep_f32, batch_tile=128)
    mean, std = jax.block_until_ready(mean), jax.block_until_ready(std)
    assert mean.shape == (B, D_out) and std.shape == (B, D_out)
    np.testing.assert_allclose(np.asarray(mean), np.asarray(ref_mean),
                               rtol=2e-5, atol=2e-5)
    np.testing.assert_allclose(np.asarray(std), np.asarray(ref_std),
                               rtol=2e-5, atol=2e-5)

    # Second call with the same prepared params (hits the jit cache; no
    # per-call weight padding/cast traffic).
    mean_r, std_r = distribution_residual_mlp(x, prep_f32, batch_tile=128)
    jax.block_until_ready(mean_r)

    # bf16 MXU-operand path (default compute dtype): loose tolerance.
    prep_bf16 = prepare_params(params, compute_dtype=jnp.bfloat16)
    mean_b, std_b = distribution_residual_mlp(x, prep_bf16, batch_tile=128)
    mean_b, std_b = jax.block_until_ready(mean_b), jax.block_until_ready(std_b)
    np.testing.assert_allclose(np.asarray(mean_b), np.asarray(ref_mean),
                               rtol=3e-2, atol=3e-2)
    np.testing.assert_allclose(np.asarray(std_b), np.asarray(ref_std),
                               rtol=3e-2, atol=3e-2)

    # --- Config 2: non-aligned shapes + 6 residual blocks (exercises H/D_in/
    #     D_out padding, batch padding, >=2 grid steps, and the
    #     fori_loop(unroll=2) block path). ---
    B2, D_in2, H2, NHL2, D_out2 = 20, 10, 200, 12, 3
    x2 = jax.random.normal(kx2, (B2, D_in2), jnp.float32)
    params2 = init_params(kp2, D_in2, H2, NHL2, D_out2)
    ref_mean2, ref_std2 = reference_forward(x2, params2)

    prep2_f32 = prepare_params(params2, compute_dtype=jnp.float32)
    mean2, std2 = distribution_residual_mlp(x2, prep2_f32, batch_tile=256)
    mean2, std2 = jax.block_until_ready(mean2), jax.block_until_ready(std2)
    assert mean2.shape == (B2, D_out2) and std2.shape == (B2, D_out2)
    np.testing.assert_allclose(np.asarray(mean2), np.asarray(ref_mean2),
                               rtol=1e-4, atol=1e-4)
    np.testing.assert_allclose(np.asarray(std2), np.asarray(ref_std2),
                               rtol=1e-4, atol=1e-4)

    print("KERNEL_OK")
</pallas_src>

<mosaic_0001>
module attributes {stable_mosaic.version = 11 : i64} {
  func.func @_mlp_kernel(%arg0: i32, %arg1: memref<8x128xf32, #tpu.memory_space<vmem>>, %arg2: memref<128x128xf32, #tpu.memory_space<vmem>>, %arg3: memref<1x128xf32, #tpu.memory_space<vmem>>, %arg4: memref<1x128x128xf32, #tpu.memory_space<vmem>>, %arg5: memref<1x1x128xf32, #tpu.memory_space<vmem>>, %arg6: memref<1x128x128xf32, #tpu.memory_space<vmem>>, %arg7: memref<1x1x128xf32, #tpu.memory_space<vmem>>, %arg8: memref<128x128xf32, #tpu.memory_space<vmem>>, %arg9: memref<1x128xf32, #tpu.memory_space<vmem>>, %arg10: memref<8x128xf32, #tpu.memory_space<vmem>>) attributes {dimension_semantics = [#tpu.dimension_semantics<parallel>], iteration_bounds = array<i64: 1>, scalar_prefetch = 0 : i64, scratch_operands = 0 : i64, tpu.core_type = #tpu.core_type<tc>, window_params = [{transform_indices = @transform_0, window_bounds = array<i64: 8, 128>}, {pipeline_mode = #tpu.pipeline_mode<synchronous>, transform_indices = @transform_1, window_bounds = array<i64: 128, 128>}, {pipeline_mode = #tpu.pipeline_mode<synchronous>, transform_indices = @transform_2, window_bounds = array<i64: 1, 128>}, {pipeline_mode = #tpu.pipeline_mode<synchronous>, transform_indices = @transform_3, window_bounds = array<i64: 1, 128, 128>}, {pipeline_mode = #tpu.pipeline_mode<synchronous>, transform_indices = @transform_4, window_bounds = array<i64: 1, 1, 128>}, {pipeline_mode = #tpu.pipeline_mode<synchronous>, transform_indices = @transform_5, window_bounds = array<i64: 1, 128, 128>}, {pipeline_mode = #tpu.pipeline_mode<synchronous>, transform_indices = @transform_6, window_bounds = array<i64: 1, 1, 128>}, {pipeline_mode = #tpu.pipeline_mode<synchronous>, transform_indices = @transform_7, window_bounds = array<i64: 128, 128>}, {pipeline_mode = #tpu.pipeline_mode<synchronous>, transform_indices = @transform_8, window_bounds = array<i64: 1, 128>}, {transform_indices = @transform_9, window_bounds = array<i64: 8, 128>}]} {
    %c0 = arith.constant 0 : index
    %c0_0 = arith.constant 0 : index
    %0 = vector.load %arg1[%c0, %c0_0] : memref<8x128xf32, #tpu.memory_space<vmem>>, vector<8x128xf32>
    %c0_1 = arith.constant 0 : index
    %c0_2 = arith.constant 0 : index
    %1 = vector.load %arg2[%c0_1, %c0_2] : memref<128x128xf32, #tpu.memory_space<vmem>>, vector<128x128xf32>
    %cst = arith.constant dense<0.000000e+00> : vector<8x128xf32>
    %2 = tpu.matmul %0, %1, %cst {dimension_numbers = #tpu.dot_dimension_numbers<[1], [0], [0], [1], [0, 0, 1, 1], [], []>} : vector<8x128xf32>, vector<128x128xf32>, vector<8x128xf32> -> vector<8x128xf32>
    %c0_3 = arith.constant 0 : index
    %c0_4 = arith.constant 0 : index
    %3 = vector.load %arg3[%c0_3, %c0_4] : memref<1x128xf32, #tpu.memory_space<vmem>>, vector<1x128xf32>
    %4 = vector.broadcast %3 : vector<1x128xf32> to vector<8x128xf32>
    %5 = arith.addf %2, %4 : vector<8x128xf32>
    %cst_5 = arith.constant 2.000000e+01 : f32
    %6 = vector.broadcast %cst_5 : f32 to vector<8x128xf32>
    %7 = arith.minimumf %5, %6 : vector<8x128xf32>
    %8 = math.exp %7 : vector<8x128xf32>
    %cst_6 = arith.constant 2.000000e+00 : f32
    %9 = vector.broadcast %cst_6 : f32 to vector<8x128xf32>
    %10 = arith.addf %8, %9 : vector<8x128xf32>
    %11 = arith.mulf %8, %10 : vector<8x128xf32>
    %cst_7 = arith.constant 2.000000e+00 : f32
    %12 = vector.broadcast %cst_7 : f32 to vector<8x128xf32>
    %13 = arith.addf %11, %12 : vector<8x128xf32>
    %14 = arith.divf %11, %13 : vector<8x128xf32>
    %15 = arith.mulf %5, %14 : vector<8x128xf32>
    %cst_8 = arith.constant 2.000000e+01 : f32
    %16 = vector.broadcast %cst_8 : f32 to vector<8x128xf32>
    %17 = arith.cmpf ogt, %5, %16 : vector<8x128xf32>
    %18 = arith.select %17, %5, %15 : vector<8x128xi1>, vector<8x128xf32>
    %c0_9 = arith.constant 0 : index
    %c0_10 = arith.constant 0 : index
    %c0_11 = arith.constant 0 : index
    %19 = vector.load %arg4[%c0_9, %c0_10, %c0_11] : memref<1x128x128xf32, #tpu.memory_space<vmem>>, vector<1x128x128xf32>
    %20 = vector.shape_cast %19 : vector<1x128x128xf32> to vector<128x128xf32>
    %cst_12 = arith.constant dense<0.000000e+00> : vector<8x128xf32>
    %21 = tpu.matmul %18, %20, %cst_12 {dimension_numbers = #tpu.dot_dimension_numbers<[1], [0], [0], [1], [0, 0, 1, 1], [], []>} : vector<8x128xf32>, vector<128x128xf32>, vector<8x128xf32> -> vector<8x128xf32>
    %c0_13 = arith.constant 0 : index
    %c0_14 = arith.constant 0 : index
    %c0_15 = arith.constant 0 : index
    %22 = vector.load %arg5[%c0_13, %c0_14, %c0_15] : memref<1x1x128xf32, #tpu.memory_space<vmem>>, vector<1x1x128xf32>
    %23 = vector.shape_cast %22 : vector<1x1x128xf32> to vector<1x128xf32>
    %24 = vector.broadcast %23 : vector<1x128xf32> to vector<8x128xf32>
    %25 = arith.addf %21, %24 : vector<8x128xf32>
    %cst_16 = arith.constant 2.000000e+01 : f32
    %26 = vector.broadcast %cst_16 : f32 to vector<8x128xf32>
    %27 = arith.minimumf %25, %26 : vector<8x128xf32>
    %28 = math.exp %27 : vector<8x128xf32>
    %cst_17 = arith.constant 2.000000e+00 : f32
    %29 = vector.broadcast %cst_17 : f32 to vector<8x128xf32>
    %30 = arith.addf %28, %29 : vector<8x128xf32>
    %31 = arith.mulf %28, %30 : vector<8x128xf32>
    %cst_18 = arith.constant 2.000000e+00 : f32
    %32 = vector.broadcast %cst_18 : f32 to vector<8x128xf32>
    %33 = arith.addf %31, %32 : vector<8x128xf32>
    %34 = arith.divf %31, %33 : vector<8x128xf32>
    %35 = arith.mulf %25, %34 : vector<8x128xf32>
    %cst_19 = arith.constant 2.000000e+01 : f32
    %36 = vector.broadcast %cst_19 : f32 to vector<8x128xf32>
    %37 = arith.cmpf ogt, %25, %36 : vector<8x128xf32>
    %38 = arith.select %37, %25, %35 : vector<8x128xi1>, vector<8x128xf32>
    %c0_20 = arith.constant 0 : index
    %c0_21 = arith.constant 0 : index
    %c0_22 = arith.constant 0 : index
    %39 = vector.load %arg6[%c0_20, %c0_21, %c0_22] : memref<1x128x128xf32, #tpu.memory_space<vmem>>, vector<1x128x128xf32>
    %40 = vector.shape_cast %39 : vector<1x128x128xf32> to vector<128x128xf32>
    %cst_23 = arith.constant dense<0.000000e+00> : vector<8x128xf32>
    %41 = tpu.matmul %38, %40, %cst_23 {dimension_numbers = #tpu.dot_dimension_numbers<[1], [0], [0], [1], [0, 0, 1, 1], [], []>} : vector<8x128xf32>, vector<128x128xf32>, vector<8x128xf32> -> vector<8x128xf32>
    %c0_24 = arith.constant 0 : index
    %c0_25 = arith.constant 0 : index
    %c0_26 = arith.constant 0 : index
    %42 = vector.load %arg7[%c0_24, %c0_25, %c0_26] : memref<1x1x128xf32, #tpu.memory_space<vmem>>, vector<1x1x128xf32>
    %43 = vector.shape_cast %42 : vector<1x1x128xf32> to vector<1x128xf32>
    %44 = vector.broadcast %43 : vector<1x128xf32> to vector<8x128xf32>
    %45 = arith.addf %41, %44 : vector<8x128xf32>
    %46 = arith.addf %5, %45 : vector<8x128xf32>
    %c0_27 = arith.constant 0 : index
    %c0_28 = arith.constant 0 : index
    %47 = vector.load %arg8[%c0_27, %c0_28] : memref<128x128xf32, #tpu.memory_space<vmem>>, vector<128x128xf32>
    %cst_29 = arith.constant dense<0.000000e+00> : vector<8x128xf32>
    %48 = tpu.matmul %46, %47, %cst_29 {dimension_numbers = #tpu.dot_dimension_numbers<[1], [0], [0], [1], [0, 0, 1, 1], [], []>} : vector<8x128xf32>, vector<128x128xf32>, vector<8x128xf32> -> vector<8x128xf32>
    %c0_30 = arith.constant 0 : index
    %c0_31 = arith.constant 0 : index
    %49 = vector.load %arg9[%c0_30, %c0_31] : memref<1x128xf32, #tpu.memory_space<vmem>>, vector<1x128xf32>
    %50 = vector.broadcast %49 : vector<1x128xf32> to vector<8x128xf32>
    %51 = arith.addf %48, %50 : vector<8x128xf32>
    %c0_32 = arith.constant 0 : index
    %c0_33 = arith.constant 0 : index
    %52 = vector.load %arg10[%c0_32, %c0_33] : memref<8x128xf32, #tpu.memory_space<vmem>>, vector<8x128xf32>
    tpu.vector_store %arg10[%c0_32, %c0_33], %51 {strides = array<i32>} : memref<8x128xf32, #tpu.memory_space<vmem>>, vector<8x128xf32>,
    return
  }
  func.func @transform_0(%arg0: i32) -> (i32, i32) {
    %c0_i32 = arith.constant 0 : i32
    %c0_i32_0 = arith.constant 0 : i32
    return %arg0, %c0_i32 : i32, i32
  }
  func.func @transform_1(%arg0: i32) -> (i32, i32) {
    %c0_i32 = arith.constant 0 : i32
    %c0_i32_0 = arith.constant 0 : i32
    %c0_i32_1 = arith.constant 0 : i32
    return %c0_i32, %c0_i32_0 : i32, i32
  }
  func.func @transform_2(%arg0: i32) -> (i32, i32) {
    %c0_i32 = arith.constant 0 : i32
    %c0_i32_0 = arith.constant 0 : i32
    %c0_i32_1 = arith.constant 0 : i32
    return %c0_i32, %c0_i32_0 : i32, i32
  }
  func.func @transform_3(%arg0: i32) -> (i32, i32, i32) {
    %c0_i32 = arith.constant 0 : i32
    %c0_i32_0 = arith.constant 0 : i32
    %c0_i32_1 = arith.constant 0 : i32
    %c0_i32_2 = arith.constant 0 : i32
    return %c0_i32, %c0_i32_0, %c0_i32_1 : i32, i32, i32
  }
  func.func @transform_4(%arg0: i32) -> (i32, i32, i32) {
    %c0_i32 = arith.constant 0 : i32
    %c0_i32_0 = arith.constant 0 : i32
    %c0_i32_1 = arith.constant 0 : i32
    %c0_i32_2 = arith.constant 0 : i32
    return %c0_i32, %c0_i32_0, %c0_i32_1 : i32, i32, i32
  }
  func.func @transform_5(%arg0: i32) -> (i32, i32, i32) {
    %c0_i32 = arith.constant 0 : i32
    %c0_i32_0 = arith.constant 0 : i32
    %c0_i32_1 = arith.constant 0 : i32
    %c0_i32_2 = arith.constant 0 : i32
    return %c0_i32, %c0_i32_0, %c0_i32_1 : i32, i32, i32
  }
  func.func @transform_6(%arg0: i32) -> (i32, i32, i32) {
    %c0_i32 = arith.constant 0 : i32
    %c0_i32_0 = arith.constant 0 : i32
    %c0_i32_1 = arith.constant 0 : i32
    %c0_i32_2 = arith.constant 0 : i32
    return %c0_i32, %c0_i32_0, %c0_i32_1 : i32, i32, i32
  }
  func.func @transform_7(%arg0: i32) -> (i32, i32) {
    %c0_i32 = arith.constant 0 : i32
    %c0_i32_0 = arith.constant 0 : i32
    %c0_i32_1 = arith.constant 0 : i32
    return %c0_i32, %c0_i32_0 : i32, i32
  }
  func.func @transform_8(%arg0: i32) -> (i32, i32) {
    %c0_i32 = arith.constant 0 : i32
    %c0_i32_0 = arith.constant 0 : i32
    %c0_i32_1 = arith.constant 0 : i32
    return %c0_i32, %c0_i32_0 : i32, i32
  }
  func.func @transform_9(%arg0: i32) -> (i32, i32) {
    %c0_i32 = arith.constant 0 : i32
    %c0_i32_0 = arith.constant 0 : i32
    return %arg0, %c0_i32 : i32, i32
  }
}

</mosaic_0001>

<bundles_post_ra>
// kernel: _forward.1
= control target key start
LH: loop header
LB: loop body
LE: loop exit
PB: predicated region body
PF: predicated region fallthrough
CT: control target
= control target key end

     0   :  { %14 = vsyncpa [#allocation3], 0  ;;  %s1108_s0 = inlined_call_operand.vmem [shape: f32[8,128], index: 0, kind: input, shape index: {}]   ;;  %s1109_s1 = inlined_call_operand.hbm [shape: f32[128,128], index: 1, kind: input, shape index: {}]   ;;  %s1110_s2 = inlined_call_operand.vmem [shape: f32[1,128], index: 2, kind: input, shape index: {}]   ;;  %s1111_s3 = inlined_call_operand.hbm [shape: f32[1,128,128], index: 3, kind: input, shape index: {}]   ;;  %s1112_s4 = inlined_call_operand.vmem [shape: f32[1,1,128], index: 4, kind: input, shape index: {}]   ;;  %s1113_s5 = inlined_call_operand.hbm [shape: f32[1,128,128], index: 5, kind: input, shape index: {}]   ;;  %s1114_s6 = inlined_call_operand.vmem [shape: f32[1,1,128], index: 6, kind: input, shape index: {}]   ;;  %s1115_s7 = inlined_call_operand.hbm [shape: f32[128,128], index: 7, kind: input, shape index: {}]   ;;  %s1116_s8 = inlined_call_operand.vmem [shape: f32[1,128], index: 8, kind: input, shape index: {}]   ;;  %s1117_s9 = inlined_call_operand.vmem [shape: f32[8,128], index: 9, kind: output, shape index: {}]  }
   0x1   :  { %15 = vsyncpa [#allocation5], 0 }
   0x2   :  { %16 = vsyncpa [#allocation8], 0  ;;  %s910_s30 = smov [#allocation4]   ;;  %s911_s11 = smov [#allocation2]  }
   0x3   :  { %s38_s10 = sshll.u32 %s910_s30, 4  ;;  %s24_s12 = sshll.u32 %s911_s11, 4  ;;  %s39_s10 = int_to_ptr.vmem [resolvable:$true] %s38_s10  ;;  %s969_s12 = int_to_ptr.vmem [resolvable:$true] %s24_s12 }
   0x4   :  { %s816_s15 = scalar_lea.hbm %s1111_s3, 2048 }
   0x5   :  { %p817_p0 = scmp.ne.s32.totalorder %s1111_s3, %s816_s15  ;;  %p820_p1 = scmp.lt.u32.totalorder %s816_s15, %s1111_s3 }
   0x7   :  { %p822_p2 = pnand %p820_p1, %p817_p0 }
   0x9   :  { %825 = shalt.err (!%p822_p2)
}
   0xa   :  { %s826_s20 = scalar_lea.vmem %s39_s10, 2048  ;;  %p831_p4 = scmp.lt.s32.totalorder %s39_s10, %s39_s10 }
   0xb   :  { %p827_p3 = scmp.ne.s32.totalorder %s39_s10, %s826_s20  ;;  %p832_p5 = scmp.lt.s32.totalorder %s826_s20, %s826_s20 }
   0xd   :  { %p833_p6 = por %p832_p5, %p831_p4 }
   0xf   :  { %p834_p7 = pnand %p833_p6, %p827_p3 }
  0x11   :  { %837 = shalt.err (!%p834_p7)
}
  0x12   :  { %s912_s21 = smov 128   ;;  %s913_s22 = smov 8  }
  0x13   :  { %44 = dma.hbm_to_vmem [thread:$0]  %s1111_s3, 2048, %s39_s10, [#allocation5], %s912_s21, %s912_s21, %s913_s22  }
  0x14   :  { %s838_s27 = scalar_lea.hbm %s1109_s1, 2048 }
  0x15   :  { %p839_p8 = scmp.ne.s32.totalorder %s1109_s1, %s838_s27  ;;  %p842_p9 = scmp.lt.u32.totalorder %s838_s27, %s1109_s1 }
  0x17   :  { %p844_p10 = pnand %p842_p9, %p839_p8 }
  0x19   :  { %847 = shalt.err (!%p844_p10)
}
  0x1a   :  { %s848_s13 = scalar_lea.vmem %s969_s12, 2048  ;;  %p853_p12 = scmp.lt.s32.totalorder %s969_s12, %s969_s12 }
  0x1b   :  { %p849_p11 = scmp.ne.s32.totalorder %s969_s12, %s848_s13  ;;  %p854_p13 = scmp.lt.s32.totalorder %s848_s13, %s848_s13 }
  0x1d   :  { %p855_p0 = por %p854_p13, %p853_p12 }
  0x1f   :  { %p856_p1 = pnand %p855_p0, %p849_p11 }
  0x21   :  { %859 = shalt.err (!%p856_p1)
}
  0x22   :  { %30 = dma.hbm_to_vmem [thread:$0]  %s1109_s1, 2048, %s969_s12, [#allocation3], %s912_s21, %s912_s21, %s913_s22  }
  0x23   :  { %s914_s14 = smov [#allocation6]   ;;  %s915_s16 = smov [#allocation7]  }
  0x24   :  { %s52_s15 = sshll.u32 %s914_s14, 4  ;;  %s66_s17 = sshll.u32 %s915_s16, 4  ;;  %s53_s15 = int_to_ptr.vmem [resolvable:$true] %s52_s15  ;;  %s1006_s17 = int_to_ptr.vmem [resolvable:$true] %s66_s17 }
  0x25   :  { %s860_s20 = scalar_lea.hbm %s1113_s5, 2048 }
  0x26   :  { %p861_p2 = scmp.ne.s32.totalorder %s1113_s5, %s860_s20  ;;  %p864_p3 = scmp.lt.u32.totalorder %s860_s20, %s1113_s5 }
  0x28   :  { %p866_p4 = pnand %p864_p3, %p861_p2 }
  0x2a   :  { %869 = shalt.err (!%p866_p4)
}
  0x2b   :  { %s870_s1 = scalar_lea.vmem %s53_s15, 2048  ;;  %p875_p6 = scmp.lt.s32.totalorder %s53_s15, %s53_s15 }
  0x2c   :  { %p871_p5 = scmp.ne.s32.totalorder %s53_s15, %s870_s1  ;;  %p876_p7 = scmp.lt.s32.totalorder %s870_s1, %s870_s1 }
  0x2e   :  { %p877_p8 = por %p876_p7, %p875_p6 }
  0x30   :  { %p878_p9 = pnand %p877_p8, %p871_p5 }
  0x32   :  { %881 = shalt.err (!%p878_p9)
}
  0x33   :  { %58 = dma.hbm_to_vmem [thread:$0]  %s1113_s5, 2048, %s53_s15, [#allocation5], %s912_s21, %s912_s21, %s913_s22  }
  0x34   :  { %s882_s30 = scalar_lea.hbm %s1115_s7, 2048 }
  0x35   :  { %p883_p10 = scmp.ne.s32.totalorder %s1115_s7, %s882_s30  ;;  %p886_p11 = scmp.lt.u32.totalorder %s882_s30, %s1115_s7 }
  0x37   :  { %p888_p12 = pnand %p886_p11, %p883_p10 }
  0x39   :  { %891 = shalt.err (!%p888_p12)
}
  0x3a   :  { %s892_s14 = scalar_lea.vmem %s1006_s17, 2048  ;;  %p897_p0 = scmp.lt.s32.totalorder %s1006_s17, %s1006_s17 }
  0x3b   :  { %p893_p13 = scmp.ne.s32.totalorder %s1006_s17, %s892_s14  ;;  %p898_p1 = scmp.lt.s32.totalorder %s892_s14, %s892_s14 }
  0x3d   :  { %p899_p2 = por %p898_p1, %p897_p0 }
  0x3f   :  { %p900_p3 = pnand %p899_p2, %p893_p13 }
  0x41   :  { %903 = shalt.err (!%p900_p3)
}
  0x42   :  { %72 = dma.hbm_to_vmem [thread:$0]  %s1115_s7, 2048, %s1006_s17, [#allocation8], %s912_s21, %s912_s21, %s913_s22  }
  0x43   :  { %904 = dma.done.wait [#allocation3], 2048  }
  0x44   :  { %905 = vsyncadd [#allocation3], 4294965248 }
  0x45   :  { %906 = dma.done.wait [#allocation5], 4096  }
  0x46   :  { %907 = vsyncadd [#allocation5], 4294963200 }
  0x47   :  { %908 = dma.done.wait [#allocation8], 2048  }
  0x48   :  { %909 = vsyncadd [#allocation8], 4294965248  ;;  %v916_v0 = vmov 0.0|0.0   ;;  %vm917_vm0 = vmmov 0   ;;  %v918_v1 = vmov 0.0   ;;  %v88_v2 = vld [vmem:[#allocation2] sm:$0xff] }
  0x49   :  { %703 = vmatprep.subr.bf16.mxu0 %v916_v0  ;;  %595 = vmatprep.mubr.msk.f32.mxu0 %vm917_vm0, %v918_v1  ;;  %v89_v3 = vld [vmem:[#allocation2 + $0x8] sm:$0xff]  ;;  %v90_v4 = vld [vmem:[#allocation2 + $0x10] sm:$0xff]  ;;  %v91_v6 = vld [vmem:[#allocation2 + $0x18] sm:$0xff] }
  0x4a   :  { %727 = vmatprep.subr.bf16.mxu1 %v916_v0  ;;  %630 = vmatprep.mubr.msk.f32.mxu1 %vm917_vm0, %v918_v1  ;;  %v704_v5 = vpack.c.bf16 %v89_v3, %v88_v2  ;;  %v707_v7 = vpack.c.bf16 %v91_v6, %v90_v4  ;;  %v92_v8 = vld [vmem:[#allocation2 + $0x20] sm:$0xff]  ;;  %v93_v9 = vld [vmem:[#allocation2 + $0x28] sm:$0xff]  ;;  %v94_v11 = vld [vmem:[#allocation2 + $0x30] sm:$0xff] }
  0x4b   :  { %v710_v10 = vpack.c.bf16 %v93_v9, %v92_v8  ;;  %v95_v12 = vld [vmem:[#allocation2 + $0x38] sm:$0xff]  ;;  %v96_v14 = vld [vmem:[#allocation2 + $0x40] sm:$0xff]  ;;  %v97_v15 = vld [vmem:[#allocation2 + $0x48] sm:$0xff] }
  0x4c   :  { %705 = vmatpush3.bf16.msra.mxu0 %v704_v5  ;;  %v713_v13 = vpack.c.bf16 %v95_v12, %v94_v11  ;;  %v716_v16 = vpack.c.bf16 %v97_v15, %v96_v14  ;;  %v98_v17 = vld [vmem:[#allocation2 + $0x50] sm:$0xff]  ;;  %v99_v18 = vld [vmem:[#allocation2 + $0x58] sm:$0xff]  ;;  %v100_v20 = vld [vmem:[#allocation2 + $0x60] sm:$0xff] }
  0x4d   :  { %706 = vmatprep.subr.bf16.mxu0 %v916_v0  ;;  %v719_v19 = vpack.c.bf16 %v99_v18, %v98_v17  ;;  %v101_v21 = vld [vmem:[#allocation2 + $0x68] sm:$0xff]  ;;  %v102_v23 = vld [vmem:[#allocation2 + $0x70] sm:$0xff]  ;;  %v103_v24 = vld [vmem:[#allocation2 + $0x78] sm:$0xff] }
  0x4e   :  { %v722_v22 = vpack.c.bf16 %v101_v21, %v100_v20  ;;  %v725_v25 = vpack.c.bf16 %v103_v24, %v102_v23  ;;  %v87_v26 = vld [vmem:[%s1108_s0] sm:$0xff]  ;;  %v193_v28 = vld [vmem:[#allocation4 + $0x8] sm:$0xff]  ;;  %v194_v30 = vld [vmem:[#allocation4 + $0x10] sm:$0xff] }
  0x4f   :  { %v192_v27 = vld [vmem:[#allocation4] sm:$0xff]  ;;  %v195_v31 = vld [vmem:[#allocation4 + $0x18] sm:$0xff]  ;;  %v197_v34 = vld [vmem:[#allocation4 + $0x28] sm:$0xff] }
  0x50   :  { %708 = vmatpush3.bf16.msra.mxu0 %v707_v7  ;;  %v728_v29 = vpack.c.bf16 %v193_v28, %v192_v27  ;;  %v731_v32 = vpack.c.bf16 %v195_v31, %v194_v30  ;;  %v196_v33 = vld [vmem:[#allocation4 + $0x20] sm:$0xff]  ;;  %v198_v36 = vld [vmem:[#allocation4 + $0x30] sm:$0xff]  ;;  %v199_v37 = vld [vmem:[#allocation4 + $0x38] sm:$0xff] }
  0x51   :  { %709 = vmatprep.subr.bf16.mxu0 %v916_v0  ;;  %v734_v35 = vpack.c.bf16 %v197_v34, %v196_v33  ;;  %v737_v38 = vpack.c.bf16 %v199_v37, %v198_v36  ;;  %v200_v39 = vld [vmem:[#allocation4 + $0x40] sm:$0xff]  ;;  %v201_v40 = vld [vmem:[#allocation4 + $0x48] sm:$0xff]  ;;  %v202_v42 = vld [vmem:[#allocation4 + $0x50] sm:$0xff] }
  0x52   :  { %729 = vmatpush3.bf16.msra.mxu1 %v728_v29  ;;  %v740_v41 = vpack.c.bf16 %v201_v40, %v200_v39  ;;  %v203_v43 = vld [vmem:[#allocation4 + $0x58] sm:$0xff]  ;;  %v204_v45 = vld [vmem:[#allocation4 + $0x60] sm:$0xff]  ;;  %v205_v46 = vld [vmem:[#allocation4 + $0x68] sm:$0xff] }
  0x53   :  { %730 = vmatprep.subr.bf16.mxu1 %v916_v0  ;;  %v743_v44 = vpack.c.bf16 %v203_v43, %v202_v42  ;;  %v746_v47 = vpack.c.bf16 %v205_v46, %v204_v45  ;;  %v206_v48 = vld [vmem:[#allocation4 + $0x70] sm:$0xff]  ;;  %v207_v49 = vld [vmem:[#allocation4 + $0x78] sm:$0xff]  ;;  %v491_v51 = vld [vmem:[%s1110_s2] ss:$0 sm:$0xff] }
  0x54   :  { %711 = vmatpush3.bf16.msra.mxu0 %v710_v10  ;;  %v749_v50 = vpack.c.bf16 %v207_v49, %v206_v48  ;;  %v296_v3 = vld [vmem:[#allocation6] sm:$0xff]  ;;  %v297_v4 = vld [vmem:[#allocation6 + $0x8] sm:$0xff]  ;;  %v298_v6 = vld [vmem:[#allocation6 + $0x10] sm:$0xff] }
  0x55   :  { %712 = vmatprep.subr.bf16.mxu0 %v916_v0  ;;  %v752_v5 = vpack.c.bf16 %v297_v4, %v296_v3  ;;  %v299_v7 = vld [vmem:[#allocation6 + $0x18] sm:$0xff]  ;;  %v300_v9 = vld [vmem:[#allocation6 + $0x20] sm:$0xff]  ;;  %v301_v10 = vld [vmem:[#allocation6 + $0x28] sm:$0xff] }
  0x56   :  { %732 = vmatpush3.bf16.msra.mxu1 %v731_v32  ;;  %v755_v8 = vpack.c.bf16 %v299_v7, %v298_v6  ;;  %v758_v11 = vpack.c.bf16 %v301_v10, %v300_v9  ;;  %v302_v12 = vld [vmem:[#allocation6 + $0x30] sm:$0xff]  ;;  %v305_v15 = vld [vmem:[#allocation6 + $0x48] sm:$0xff]  ;;  %v307_v18 = vld [vmem:[#allocation6 + $0x58] sm:$0xff] }
  0x57   :  { %733 = vmatprep.subr.bf16.mxu1 %v916_v0  ;;  %v306_v17 = vld [vmem:[#allocation6 + $0x50] sm:$0xff]  ;;  %v308_v20 = vld [vmem:[#allocation6 + $0x60] sm:$0xff]  ;;  %v309_v21 = vld [vmem:[#allocation6 + $0x68] sm:$0xff] }
  0x58   :  { %714 = vmatpush3.bf16.msra.mxu0 %v713_v13  ;;  %v303_v13 = vld [vmem:[#allocation6 + $0x38] sm:$0xff]  ;;  %v310_v23 = vld [vmem:[#allocation6 + $0x70] sm:$0xff]  ;;  %v391_v27 = vld [vmem:[#allocation7 + $0x8] sm:$0xff] }
  0x59   :  { %715 = vmatprep.subr.bf16.mxu0 %v916_v0  ;;  %v761_v14 = vpack.c.bf16 %v303_v13, %v302_v12  ;;  %v311_v24 = vld [vmem:[#allocation6 + $0x78] sm:$0xff]  ;;  %v392_v28 = vld [vmem:[#allocation7 + $0x10] sm:$0xff]  ;;  %v394_v32 = vld [vmem:[#allocation7 + $0x20] sm:$0xff] }
  0x5a   :  { %735 = vmatpush3.bf16.msra.mxu1 %v734_v35  ;;  %v393_v30 = vld [vmem:[#allocation7 + $0x18] sm:$0xff]  ;;  %v395_v33 = vld [vmem:[#allocation7 + $0x28] sm:$0xff]  ;;  %v396_v35 = vld [vmem:[#allocation7 + $0x30] sm:$0xff] }
  0x5b   :  { %736 = vmatprep.subr.bf16.mxu1 %v916_v0  ;;  %v779_v31 = vpack.c.bf16 %v393_v30, %v392_v28  ;;  %v782_v34 = vpack.c.bf16 %v395_v33, %v394_v32  ;;  %v397_v36 = vld [vmem:[#allocation7 + $0x38] sm:$0xff]  ;;  %v399_v39 = vld [vmem:[#allocation7 + $0x48] sm:$0xff]  ;;  %v494_v7 = vld [vmem:[%s1116_s8] ss:$0 sm:$0xff] }
  0x5c   :  { %717 = vmatpush3.bf16.msra.mxu0 %v716_v16  ;;  %v785_v37 = vpack.c.bf16 %v397_v36, %v396_v35  ;;  %v401_v42 = vld [vmem:[#allocation7 + $0x58] sm:$0xff]  ;;  %v403_v45 = vld [vmem:[#allocation7 + $0x68] sm:$0xff] }
  0x5d   :  { %718 = vmatprep.subr.bf16.mxu0 %v916_v0 }
  0x5e   :  { %738 = vmatpush3.bf16.msra.mxu1 %v737_v38  ;;  %v398_v38 = vld [vmem:[#allocation7 + $0x40] sm:$0xff] }
  0x5f   :  { %739 = vmatprep.subr.bf16.mxu1 %v916_v0  ;;  %v788_v40 = vpack.c.bf16 %v399_v39, %v398_v38 }
  0x60   :  { %720 = vmatpush3.bf16.msra.mxu0 %v719_v19  ;;  %v767_v19 = vpack.c.bf16 %v307_v18, %v306_v17 }
  0x61   :  { %721 = vmatprep.subr.bf16.mxu0 %v916_v0 }
  0x62   :  { %741 = vmatpush3.bf16.msra.mxu1 %v740_v41  ;;  %v400_v41 = vld [vmem:[#allocation7 + $0x50] sm:$0xff] }
  0x63   :  { %742 = vmatprep.subr.bf16.mxu1 %v916_v0  ;;  %v791_v43 = vpack.c.bf16 %v401_v42, %v400_v41 }
  0x64   :  { %723 = vmatpush3.bf16.msra.mxu0 %v722_v22  ;;  %v770_v22 = vpack.c.bf16 %v309_v21, %v308_v20 }
  0x65   :  { %724 = vmatprep.subr.bf16.mxu0 %v916_v0 }
  0x66   :  { %744 = vmatpush3.bf16.msra.mxu1 %v743_v44  ;;  %v402_v44 = vld [vmem:[#allocation7 + $0x60] sm:$0xff] }
  0x67   :  { %745 = vmatprep.subr.bf16.mxu1 %v916_v0  ;;  %v794_v46 = vpack.c.bf16 %v403_v45, %v402_v44 }
  0x68   :  { %726 = vmatpush3.bf16.msra.mxu0 %v725_v25  ;;  %v773_v25 = vpack.c.bf16 %v311_v24, %v310_v23 }
  0x69   :  { %751 = vmatprep.subr.bf16.mxu0 %v916_v0 }
  0x6a   :  { %747 = vmatpush3.bf16.msra.mxu1 %v746_v47  ;;  %v492_v47 = vld [vmem:[%s1112_s4] ss:$0 sm:$0xff] }
  0x6b   :  { %596 = vmatmul.mubr.f32.vlgmr.msra.gmra.mrb[0].mxu0 %v87_v26  ;;  %748 = vmatprep.subr.bf16.mxu1 %v916_v0  ;;  %v390_v26 = vld [vmem:[#allocation7] sm:$0xff] }
  0x6c   :  { %665 = vmatprep.mubr.msk.f32.mxu0 %vm917_vm0, %v918_v1  ;;  %753 = vmatpush3.bf16.msra.mxu0 %v752_v5  ;;  %v776_v29 = vpack.c.bf16 %v391_v27, %v390_v26 }
  0x6d   :  { %754 = vmatprep.subr.bf16.mxu0 %v916_v0 }
  0x6e   :  { %750 = vmatpush3.bf16.msra.mxu1 %v749_v50 }
  0x6f   :  { %775 = vmatprep.subr.bf16.mxu1 %v916_v0 }
  0x70   :  { %756 = vmatpush3.bf16.msra.mxu0 %v755_v8 }
  0x71   :  { %757 = vmatprep.subr.bf16.mxu0 %v916_v0 }
  0x74   :  { %759 = vmatpush3.bf16.msra.mxu0 %v758_v11 }
  0x75   :  { %760 = vmatprep.subr.bf16.mxu0 %v916_v0 }
  0x78   :  { %762 = vmatpush3.bf16.msra.mxu0 %v761_v14 }
  0x79   :  { %763 = vmatprep.subr.bf16.mxu0 %v916_v0 }
 0x13e   :  { %v177_v52 = vpop.f32.mrb[0].mxu0 }
 0x13f   :  { %v1073_v53 = vadd.f32 %v491_v51, %v177_v52  ;;  %v597_v54 = vpop.f32.mrb[1].mxu0 }
 0x141   :  { %v181_v55 = vmin.f32 %v1073_v53, 20.0  ;;  %vm190_vm1 = vcmp.gt.f32.partialorder %v1073_v53, 20.0 }
 0x143   :  { %v182_v56 = vmul.f32 1.442695, %v181_v55 }
 0x145   :  { %808 = vpow2.f32 %v182_v56 }
 0x14f   :  { %v809_v57 = vpop.eup %808 }
 0x150   :  { %v184_v58 = vadd.f32 2.0, %v809_v57 }
 0x152   :  { %v185_v59 = vmul.f32 %v809_v57, %v184_v58 }
 0x154   :  { %v186_v60 = vadd.f32 2.0, %v185_v59 }
 0x156   :  { %810 = vrcp.f32 %v186_v60 }
 0x160   :  { %v811_v61 = vpop.eup %810 }
 0x161   :  { %v188_v62 = vmul.f32 %v811_v61, %v185_v59  ;;  %v404_v61 = vld [vmem:[#allocation7 + $0x70] sm:$0xff] }
 0x163   :  { %v189_v63 = vmul.f32 %v188_v62, %v1073_v53  ;;  %v405_v62 = vld [vmem:[#allocation7 + $0x78] sm:$0xff] }
 0x165   :  { %v191_v2 = vsel %vm190_vm1, %v1073_v53, %v189_v63  ;;  %v797_v63 = vpack.c.bf16 %v405_v62, %v404_v61 }
 0x166   :  { %631 = vmatmul.mubr.f32.vlgmr.msra.gmra.mrb[0].mxu1 %v191_v2  ;;  %v493_v2 = vld [vmem:[%s1114_s6] ss:$0 sm:$0xff] }
 0x167   :  { %700 = vmatprep.mubr.msk.f32.mxu1 %vm917_vm0, %v918_v1  ;;  %v304_v1 = vld [vmem:[#allocation6 + $0x40] sm:$0xff]  ;;  %777 = vmatpush3.bf16.msra.mxu1 %v776_v29 }
 0x168   :  { %v764_v16 = vpack.c.bf16 %v305_v15, %v304_v1  ;;  %778 = vmatprep.subr.bf16.mxu1 %v916_v0 }
 0x16a   :  { %765 = vmatpush3.bf16.msra.mxu0 %v764_v16 }
 0x16b   :  { %766 = vmatprep.subr.bf16.mxu0 %v916_v0  ;;  %780 = vmatpush3.bf16.msra.mxu1 %v779_v31 }
 0x16c   :  { %781 = vmatprep.subr.bf16.mxu1 %v916_v0 }
 0x16e   :  { %768 = vmatpush3.bf16.msra.mxu0 %v767_v19 }
 0x16f   :  { %769 = vmatprep.subr.bf16.mxu0 %v916_v0  ;;  %783 = vmatpush3.bf16.msra.mxu1 %v782_v34 }
 0x170   :  { %784 = vmatprep.subr.bf16.mxu1 %v916_v0 }
 0x172   :  { %771 = vmatpush3.bf16.msra.mxu0 %v770_v22 }
 0x173   :  { %772 = vmatprep.subr.bf16.mxu0 %v916_v0  ;;  %786 = vmatpush3.bf16.msra.mxu1 %v785_v37 }
 0x174   :  { %787 = vmatprep.subr.bf16.mxu1 %v916_v0 }
 0x176   :  { %774 = vmatpush3.bf16.msra.mxu0 %v773_v25 }
 0x177   :  { %789 = vmatpush3.bf16.msra.mxu1 %v788_v40 }
 0x178   :  { %790 = vmatprep.subr.bf16.mxu1 %v916_v0 }
 0x17b   :  { %792 = vmatpush3.bf16.msra.mxu1 %v791_v43 }
 0x17c   :  { %793 = vmatprep.subr.bf16.mxu1 %v916_v0 }
 0x17f   :  { %795 = vmatpush3.bf16.msra.mxu1 %v794_v46 }
 0x180   :  { %796 = vmatprep.subr.bf16.mxu1 %v916_v0 }
 0x183   :  { %798 = vmatpush3.bf16.msra.mxu1 %v797_v63 }
 0x239   :  { %v281_v48 = vpop.f32.mrb[0].mxu1 }
 0x23a   :  { %v282_v49 = vadd.f32 %v492_v47, %v281_v48  ;;  %v632_v50 = vpop.f32.mrb[1].mxu1 }
 0x23c   :  { %v285_v51 = vmin.f32 %v282_v49, 20.0  ;;  %vm294_vm2 = vcmp.gt.f32.partialorder %v282_v49, 20.0 }
 0x23e   :  { %v286_v52 = vmul.f32 1.442695, %v285_v51 }
 0x240   :  { %812 = vpow2.f32 %v286_v52 }
 0x24a   :  { %v813_v54 = vpop.eup %812 }
 0x24b   :  { %v288_v55 = vadd.f32 2.0, %v813_v54 }
 0x24d   :  { %v289_v56 = vmul.f32 %v813_v54, %v288_v55 }
 0x24f   :  { %v290_v57 = vadd.f32 2.0, %v289_v56 }
 0x251   :  { %814 = vrcp.f32 %v290_v57 }
 0x25b   :  { %v815_v58 = vpop.eup %814 }
 0x25c   :  { %v292_v59 = vmul.f32 %v815_v58, %v289_v56 }
 0x25e   :  { %v293_v60 = vmul.f32 %v292_v59, %v282_v49 }
 0x260   :  { %v295_v0 = vsel %vm294_vm2, %v282_v49, %v293_v60 }
 0x261   :  { %666 = vmatmul.mubr.f32.vlgmr.msra.gmra.mrb[2].mxu0 %v295_v0 }
 0x334   :  { %v385_v3 = vpop.f32.mrb[2].mxu0 }
 0x335   :  { %v386_v4 = vadd.f32 %v493_v2, %v385_v3  ;;  %v667_v5 = vpop.f32.mrb[3].mxu0 }
 0x337   :  { %v389_v6 = vadd.f32 %v386_v4, %v1073_v53 }
 0x339   :  { %701 = vmatmul.mubr.f32.vlgmr.msra.gmra.mrb[2].mxu1 %v389_v6 }
 0x40c   :  { %v479_v8 = vpop.f32.mrb[2].mxu1 }
 0x40d   :  { %v480_v9 = vadd.f32 %v494_v7, %v479_v8  ;;  %v702_v10 = vpop.f32.mrb[3].mxu1 }
 0x40f   :  { %483 = vst [vmem:[%s1117_s9] sm:$0xff] %v480_v9 }
 0x410   :  { %488 = vsyncpa [#allocation3], 1 }
 0x411   :  { %489 = vsyncpa [#allocation5], 1 }
 0x412   :  { %490 = vsyncpa [#allocation8], 1 }

</bundles_post_ra>
